<compile_context>
chip_gen: v7x
topology: tpu7x:2x2x1
jax: 0.10.0
libtpu: 0.0.40
codegen_flags: <defaults>
</compile_context>

<pallas_src>
import jax
import jax.numpy as jnp
from jax.experimental import pallas as pl
from jax.experimental.pallas import tpu as pltpu

D_IN = 10
D_OUT = 10  # see TODO(synk) above

# Row-tile for large batches (multiple of 8 sublanes).
_BLOCK_B = 1024


def _linear_sinh_relu_kernel(x_ref, w_ref, b_ref, o_ref):
    x = x_ref[...]                                                    # (TB, D_in) f32
    # Linear: one MXU pass (K=10), bias broadcast on the VPU.
    v1 = jnp.dot(x, w_ref[...], preferred_element_type=jnp.float32)   # (TB, D_out)
    v1 = v1 + b_ref[...]
    # sinh(x) with a single EUP exp (jnp.sinh would lower to two exps).
    # exp(-x) = reciprocal(exp(x)): approx EUP vrcp + one Newton-Raphson step on
    # the VPU restores ~f32 accuracy, so forward semantics are kept to rounding.
    # (exp overflows for |x| >~ 88 in f32 -- fine for randn-scale inputs.)
    e = jnp.exp(x)
    r = pl.reciprocal(e, approx=True)
    r = r * (2.0 - e * r)                                              # Newton refine (VPU)
    sinh_x = 0.5 * (e - r)
    o_ref[...] = jnp.maximum(v1 + sinh_x, 0.0)                         # relu


def linear_sinh_relu(x, w, b, *, block_b=_BLOCK_B):
    """x: (B, D_IN) f32, w: (D_IN, D_OUT) f32, b: (1, D_OUT) f32 -> (B, D_OUT) f32."""
    B, d_in = x.shape
    d_out = w.shape[1]
    # Small batch -> one full-array row block (full-extent dims are always legal).
    # Large batch -> 8-row-multiple tiles so the grid pipelines and fits VMEM.
    tb = B if B <= block_b else block_b
    grid = (pl.cdiv(B, tb),)
    return pl.pallas_call(
        _linear_sinh_relu_kernel,
        out_shape=jax.ShapeDtypeStruct((B, d_out), jnp.float32),
        grid=grid,
        in_specs=[
            # x: tiled over the batch axis.
            pl.BlockSpec((tb, d_in), lambda i: (i, 0),
                         memory_space=pltpu.MemorySpace.VMEM),
            # w, b: same block for every grid step -> fetched once, stay resident.
            pl.BlockSpec((d_in, d_out), lambda i: (0, 0),
                         memory_space=pltpu.MemorySpace.VMEM),
            pl.BlockSpec((1, d_out), lambda i: (0, 0),
                         memory_space=pltpu.MemorySpace.VMEM),
        ],
        out_specs=pl.BlockSpec((tb, d_out), lambda i: (i, 0),
                               memory_space=pltpu.MemorySpace.VMEM),
        compiler_params=pltpu.CompilerParams(
            # Batch axis is embarrassingly parallel: shards across v7x's 2 TCs.
            dimension_semantics=("parallel",),
        ),
    )(x, w, b)


if __name__ == "__main__":
    key = jax.random.PRNGKey(0)
    kx, kw, kb, kx2 = jax.random.split(key, 4)

    # deterministic synthetic parameters (PyTorch-like small uniform init)
    bound = 1.0 / (D_IN ** 0.5)
    w = jax.random.uniform(kw, (D_IN, D_OUT), jnp.float32, -bound, bound)
    b = jax.random.uniform(kb, (1, D_OUT), jnp.float32, -bound, bound)

    def reference(x):
        return jnp.maximum(x @ w + b + jnp.sinh(x), 0.0)

    # 1) the module's own shape: x1 = randn(2, 10) -> single full-array block.
    x1 = jax.random.normal(kx, (2, D_IN), jnp.float32)
    out = jax.block_until_ready(linear_sinh_relu(x1, w, b))
    assert out.shape == (2, D_OUT)
    assert jnp.allclose(out, reference(x1), atol=1e-4, rtol=1e-4)

    # 2) larger batch: exercises the tiled / pipelined / megacore-parallel path.
    xb = jax.random.normal(kx2, (4096, D_IN), jnp.float32)
    out_b = jax.block_until_ready(linear_sinh_relu(xb, w, b))
    assert out_b.shape == (4096, D_OUT)
    assert jnp.allclose(out_b, reference(xb), atol=1e-4, rtol=1e-4)

    print("KERNEL_OK")
</pallas_src>

<mosaic_0001>
module attributes {stable_mosaic.version = 11 : i64} {
  func.func @_linear_sinh_relu_kernel(%arg0: i32, %arg1: memref<2x10xf32, #tpu.memory_space<vmem>>, %arg2: memref<10x10xf32, #tpu.memory_space<vmem>>, %arg3: memref<1x10xf32, #tpu.memory_space<vmem>>, %arg4: memref<2x10xf32, #tpu.memory_space<vmem>>) attributes {dimension_semantics = [#tpu.dimension_semantics<parallel>], iteration_bounds = array<i64: 1>, scalar_prefetch = 0 : i64, scratch_operands = 0 : i64, tpu.core_type = #tpu.core_type<tc>, window_params = [{transform_indices = @transform_0, window_bounds = array<i64: 2, 10>}, {pipeline_mode = #tpu.pipeline_mode<synchronous>, transform_indices = @transform_1, window_bounds = array<i64: 10, 10>}, {pipeline_mode = #tpu.pipeline_mode<synchronous>, transform_indices = @transform_2, window_bounds = array<i64: 1, 10>}, {transform_indices = @transform_3, window_bounds = array<i64: 2, 10>}]} {
    %c0 = arith.constant 0 : index
    %c0_0 = arith.constant 0 : index
    %0 = vector.load %arg1[%c0, %c0_0] : memref<2x10xf32, #tpu.memory_space<vmem>>, vector<2x10xf32>
    %c0_1 = arith.constant 0 : index
    %c0_2 = arith.constant 0 : index
    %1 = vector.load %arg2[%c0_1, %c0_2] : memref<10x10xf32, #tpu.memory_space<vmem>>, vector<10x10xf32>
    %cst = arith.constant dense<0.000000e+00> : vector<2x10xf32>
    %2 = tpu.matmul %0, %1, %cst {dimension_numbers = #tpu.dot_dimension_numbers<[1], [0], [0], [1], [0, 0, 1, 1], [], []>} : vector<2x10xf32>, vector<10x10xf32>, vector<2x10xf32> -> vector<2x10xf32>
    %c0_3 = arith.constant 0 : index
    %c0_4 = arith.constant 0 : index
    %3 = vector.load %arg3[%c0_3, %c0_4] : memref<1x10xf32, #tpu.memory_space<vmem>>, vector<1x10xf32>
    %4 = vector.broadcast %3 : vector<1x10xf32> to vector<2x10xf32>
    %5 = arith.addf %2, %4 : vector<2x10xf32>
    %6 = math.exp %0 : vector<2x10xf32>
    %7 = tpu.reciprocal %6 {approx = true} : vector<2x10xf32> -> vector<2x10xf32>
    %8 = arith.mulf %6, %7 : vector<2x10xf32>
    %cst_5 = arith.constant 2.000000e+00 : f32
    %9 = vector.broadcast %cst_5 : f32 to vector<2x10xf32>
    %10 = arith.subf %9, %8 : vector<2x10xf32>
    %11 = arith.mulf %7, %10 : vector<2x10xf32>
    %12 = arith.subf %6, %11 : vector<2x10xf32>
    %cst_6 = arith.constant 5.000000e-01 : f32
    %13 = vector.broadcast %cst_6 : f32 to vector<2x10xf32>
    %14 = arith.mulf %13, %12 : vector<2x10xf32>
    %15 = arith.addf %5, %14 : vector<2x10xf32>
    %cst_7 = arith.constant 0.000000e+00 : f32
    %16 = vector.broadcast %cst_7 : f32 to vector<2x10xf32>
    %17 = arith.maximumf %15, %16 : vector<2x10xf32>
    %c0_8 = arith.constant 0 : index
    %c0_9 = arith.constant 0 : index
    %18 = vector.load %arg4[%c0_8, %c0_9] : memref<2x10xf32, #tpu.memory_space<vmem>>, vector<2x10xf32>
    tpu.vector_store %arg4[%c0_8, %c0_9], %17 {strides = array<i32>} : memref<2x10xf32, #tpu.memory_space<vmem>>, vector<2x10xf32>,
    return
  }
  func.func @transform_0(%arg0: i32) -> (i32, i32) {
    %c0_i32 = arith.constant 0 : i32
    %c0_i32_0 = arith.constant 0 : i32
    return %arg0, %c0_i32 : i32, i32
  }
  func.func @transform_1(%arg0: i32) -> (i32, i32) {
    %c0_i32 = arith.constant 0 : i32
    %c0_i32_0 = arith.constant 0 : i32
    %c0_i32_1 = arith.constant 0 : i32
    return %c0_i32, %c0_i32_0 : i32, i32
  }
  func.func @transform_2(%arg0: i32) -> (i32, i32) {
    %c0_i32 = arith.constant 0 : i32
    %c0_i32_0 = arith.constant 0 : i32
    %c0_i32_1 = arith.constant 0 : i32
    return %c0_i32, %c0_i32_0 : i32, i32
  }
  func.func @transform_3(%arg0: i32) -> (i32, i32) {
    %c0_i32 = arith.constant 0 : i32
    %c0_i32_0 = arith.constant 0 : i32
    return %arg0, %c0_i32 : i32, i32
  }
}

</mosaic_0001>

<bundles_post_ra>
// kernel: tpu_custom_call.1
= control target key start
LH: loop header
LB: loop body
LE: loop exit
PB: predicated region body
PF: predicated region fallthrough
CT: control target
= control target key end

     0   :  { %8 = vsyncpa [#allocation3], 0  ;;  %s334_s0 = inlined_call_operand.hbm [shape: f32[2,10], index: 0, kind: input, shape index: {}]   ;;  %s335_s1 = inlined_call_operand.hbm [shape: f32[10,10], index: 1, kind: input, shape index: {}]   ;;  %s336_s2 = inlined_call_operand.vmem [shape: f32[1,10], index: 2, kind: input, shape index: {}]   ;;  %s337_s3 = inlined_call_operand.hbm [shape: f32[2,10], index: 3, kind: output, shape index: {}]  }
   0x1   :  { %9 = vsyncpa [#allocation6], 0 }
   0x2   :  { %10 = vsyncpa [#allocation4], 0  ;;  %s259_s12 = smov [#allocation2]   ;;  %s260_s14 = smov [#allocation5]  }
   0x3   :  { %s17_s13 = sshll.u32 %s259_s12, 4  ;;  %s26_s15 = sshll.u32 %s260_s14, 4  ;;  %s18_s13 = int_to_ptr.vmem [resolvable:$true] %s17_s13  ;;  %s288_s15 = int_to_ptr.vmem [resolvable:$true] %s26_s15 }
   0x4   :  { %s187_s18 = scalar_lea.hbm %s334_s0, 32 }
   0x5   :  { %p188_p0 = scmp.ne.s32.totalorder %s334_s0, %s187_s18  ;;  %p191_p1 = scmp.lt.u32.totalorder %s187_s18, %s334_s0 }
   0x7   :  { %p193_p2 = pnand %p191_p1, %p188_p0 }
   0x9   :  { %196 = shalt.err (!%p193_p2)
}
   0xa   :  { %s197_s23 = scalar_lea.vmem %s18_s13, 32  ;;  %p202_p4 = scmp.lt.s32.totalorder %s18_s13, %s18_s13 }
   0xb   :  { %p198_p3 = scmp.ne.s32.totalorder %s18_s13, %s197_s23  ;;  %p203_p5 = scmp.lt.s32.totalorder %s197_s23, %s197_s23 }
   0xd   :  { %p204_p6 = por %p203_p5, %p202_p4 }
   0xf   :  { %p205_p7 = pnand %p204_p6, %p198_p3 }
  0x11   :  { %208 = shalt.err (!%p205_p7)
}
  0x12   :  { %20 = dma.hbm_to_vmem [thread:$0]  %s334_s0, 32, %s18_s13, [#allocation3]  }
  0x13   :  { %s209_s28 = scalar_lea.hbm %s335_s1, 256 }
  0x14   :  { %p210_p8 = scmp.ne.s32.totalorder %s335_s1, %s209_s28  ;;  %p213_p9 = scmp.lt.u32.totalorder %s209_s28, %s335_s1 }
  0x16   :  { %p215_p10 = pnand %p213_p9, %p210_p8 }
  0x18   :  { %218 = shalt.err (!%p215_p10)
}
  0x19   :  { %s219_s6 = scalar_lea.vmem %s288_s15, 256  ;;  %p224_p12 = scmp.lt.s32.totalorder %s288_s15, %s288_s15 }
  0x1a   :  { %p220_p11 = scmp.ne.s32.totalorder %s288_s15, %s219_s6  ;;  %p225_p13 = scmp.lt.s32.totalorder %s219_s6, %s219_s6 }
  0x1c   :  { %p226_p0 = por %p225_p13, %p224_p12 }
  0x1e   :  { %p227_p1 = pnand %p226_p0, %p220_p11 }
  0x20   :  { %230 = shalt.err (!%p227_p1)
}
  0x21   :  { %s261_s0 = smov 128   ;;  %s262_s7 = smov 8  }
  0x22   :  { %32 = dma.hbm_to_vmem [thread:$0]  %s335_s1, 256, %s288_s15, [#allocation6], %s261_s0, %s261_s0, %s262_s7  }
  0x23   :  { %253 = dma.done.wait [#allocation3], 32  }
  0x24   :  { %254 = vsyncadd [#allocation3], 4294967264 }
  0x25   :  { %255 = dma.done.wait [#allocation6], 256  }
  0x26   :  { %256 = vsyncadd [#allocation6], 4294967040  ;;  %v263_v0 = vmov 0.0|0.0   ;;  %vm264_vm0 = vmmov 0   ;;  %v265_v1 = vmov 0.0   ;;  %vm55_vm1 = vcmask 1041408  }
  0x27   :  { %170 = vmatprep.subr.bf16.mxu0 %v263_v0  ;;  %167 = vmatprep.mubr.msk.f32.mxu0 %vm264_vm0, %v265_v1  ;;  %v42_v2 = vld [vmem:[#allocation5] sm:$0xff]  ;;  %v43_v3 = vld [vmem:[#allocation5 + $0x8] sm:$0x3]  ;;  %vm266_vm2 = vmmov 1   ;;  %v41_v5 = vld [vmem:[#allocation2] sm:$0x3] }
  0x28   :  { %vm172_vm3 = vmpackc.low %vm55_vm1, %vm266_vm2  ;;  %v171_v4 = vpack.c.bf16 %v43_v3, %v42_v2  ;;  %vm51_vm4 = vcmask 80896   ;;  %v129_v6 = vmul.f32 1.442695, %v41_v5  ;;  %v157_v13 = vld [vmem:[%s336_s2] ss:$0 sm:$0xff]  ;;  %s267_s11 = smov [#allocation7]  }
  0x29   :  { %s147_s12 = sshll.u32 %s267_s11, 4  ;;  %vm139_vm5 = vcmask 74752   ;;  %s148_s12 = int_to_ptr.vmem [resolvable:$true] %s147_s12 }
  0x2a   :  { %173 = vmatpush3.bf16.msk.msra.mxu0 %vm172_vm3, %v171_v4  ;;  %183 = vpow2.f32 %v129_v6  ;;  %s231_s13 = scalar_lea.vmem %s148_s12, 32  ;;  %p236_p3 = scmp.lt.s32.totalorder %s148_s12, %s148_s12 }
  0x2b   :  { %p232_p2 = scmp.ne.s32.totalorder %s148_s12, %s231_s13  ;;  %p237_p4 = scmp.lt.s32.totalorder %s231_s13, %s231_s13 }
  0x2d   :  { %168 = vmatmul.mubr.msk.f32.vlgmr.msra.gmra.mrb[0].mxu0 %vm51_vm4, %v41_v5  ;;  %p238_p5 = por %p237_p4, %p236_p3 }
  0x2f   :  { %p239_p6 = pnand %p238_p5, %p232_p2 }
  0x34   :  { %v184_v7 = vpop.eup %183 }
  0x35   :  { %185 = vrcp.f32 %v184_v7 }
  0x3f   :  { %v186_v8 = vpop.eup %185 }
  0x40   :  { %v132_v9 = vmul.f32 %v186_v8, %v184_v7 }
  0x42   :  { %v133_v10 = vsub.f32 2.0, %v132_v9 }
  0x44   :  { %v134_v11 = vmul.f32 %v186_v8, %v133_v10 }
  0x46   :  { %v135_v12 = vsub.f32 %v184_v7, %v134_v11 }
  0x48   :  { %v136_v14 = vmul.f32 0.5, %v135_v12 }
 0x100   :  { %v125_v15 = vpop.f32.mrb[0].mxu0 }
 0x101   :  { %v126_v16 = vadd.f32 %v157_v13, %v125_v15  ;;  %v169_v17 = vpop.f32.mrb[1].mxu0 }
 0x103   :  { %v137_v18 = vadd.f32 %v136_v14, %v126_v16 }
 0x105   :  { %v138_v19 = vmax.f32 %v137_v18, 0.0 }
 0x107   :  { %140 = vst.msk [vmem:[#allocation7] sm:$0x3] %vm139_vm5, %v138_v19 }
 0x108   :  { %242 = shalt.err (!%p239_p6)
}
 0x109   :  { %s243_s15 = scalar_lea.hbm %s337_s3, 32 }
 0x10a   :  { %p244_p7 = scmp.ne.s32.totalorder %s337_s3, %s243_s15  ;;  %p247_p8 = scmp.lt.u32.totalorder %s243_s15, %s337_s3 }
 0x10c   :  { %p249_p9 = pnand %p247_p8, %p244_p7 }
 0x10e   :  { %252 = shalt.err (!%p249_p9)
}
 0x10f   :  { %150 = dma.vmem_to_hbm [thread:$0]  %s148_s12, 32, %s337_s3, [#allocation4]  }
 0x110   :  { %257 = dma.done.wait [#allocation4], 32  }
 0x111   :  { %258 = vsyncadd [#allocation4], 4294967264 }
 0x112   :  { %154 = vsyncpa [#allocation3], 1 }
 0x113   :  { %155 = vsyncpa [#allocation6], 1 }
 0x114   :  { %156 = vsyncpa [#allocation4], 1 }

</bundles_post_ra>
